<compile_context>
chip_gen: v5e
topology: v5e:2x2
jax: 0.10.0
libtpu: 0.0.40
codegen_flags: <defaults>
</compile_context>

<pallas_src>
import jax
import jax.numpy as jnp
from jax.experimental import pallas as pl
from jax.experimental.pallas import tpu as pltpu


def _round_up(v, m):
    return ((v + m - 1) // m) * m


def sentinel_lstm_kernel(xh_ref, c_ref, w_ref, b_ref, out_ref):
    """One batch tile of the fused SentinelLSTM step.

    xh_ref : (TB, I+H)   bf16/f32  -- [x | h_tm1]
    c_ref  : (TB, Hp)    f32       -- c_tm1, zero-padded H -> Hp
    w_ref  : (I+H, 5*Hp) bf16/f32  -- [Wx_all ; Wh_all], gate blocks lane-aligned
    b_ref  : (1, 5*Hp)   f32       -- fused biases, lane-aligned
    out_ref: (TB, 3*Hp)  f32       -- [h_t | c_t | s_t]
    """
    hp = c_ref.shape[-1]

    # Single lane-dense MXU pass producing all five gate blocks (f32 accum).
    gates = jnp.dot(xh_ref[...], w_ref[...],
                    preferred_element_type=jnp.float32) + b_ref[...]

    def sig(z):
        # sigmoid(z) == 0.5*tanh(0.5*z) + 0.5 : one EUP push instead of exp+recip.
        return 0.5 * jnp.tanh(0.5 * z) + 0.5

    # Each gate block starts on a 128-lane boundary -> free static views.
    i_g = sig(gates[:, 0 * hp:1 * hp])
    f_g = sig(gates[:, 1 * hp:2 * hp])
    g_g = jnp.tanh(gates[:, 2 * hp:3 * hp])
    o_g = sig(gates[:, 3 * hp:4 * hp])
    sv = sig(gates[:, 4 * hp:5 * hp])

    c_t = f_g * c_ref[...] + i_g * g_g
    tanh_c = jnp.tanh(c_t)

    # Lane-aligned sub-stores into the single output slab.
    out_ref[:, 0 * hp:1 * hp] = (o_g * tanh_c).astype(out_ref.dtype)  # h_t
    out_ref[:, 1 * hp:2 * hp] = c_t.astype(out_ref.dtype)             # c_t
    out_ref[:, 2 * hp:3 * hp] = (sv * tanh_c).astype(out_ref.dtype)   # s_t


def sentinel_lstm(x, states,
                  w_ih, w_hh, b_ih, b_hh,
                  w_xg, b_xg, w_hg, b_hg,
                  *, block_b=512, matmul_dtype=jnp.bfloat16):
    """SentinelLSTM forward.

    x: (B, I). states = (h_tm1, c_tm1), each (B, 1, H)  (PyTorch layout).
    Weights follow PyTorch conventions:
      w_ih: (4H, I), w_hh: (4H, H), b_ih/b_hh: (4H,)   (nn.LSTMCell, gates i,f,g,o)
      w_xg: (H, I),  b_xg: (H,)                        (x_gate Linear)
      w_hg: (H, H),  b_hg: (H,)                        (h_gate Linear)
    Returns (h_t[:, None, :], c_t[:, None, :], h_t, s_t) like the PyTorch module.
    c_t is returned in float32 (cell-state precision is kept even for bf16 runs).
    """
    h_tm1, c_tm1 = states
    B, I = x.shape
    H = w_hh.shape[1]
    Hp = _round_up(H, 128)          # lane-align every gate block
    K = I + H

    h2 = h_tm1.reshape(B, H)        # .squeeze(1)
    c2 = c_tm1.reshape(B, H)

    # ---- one-time parameter fusion + lane-aligned repack (wrapper side) ----
    # Column layout of the fused weights: [ i | f | g | o | sentinel ], each
    # gate block padded H -> Hp so it starts on a 128-lane boundary.
    def pad_cols(m):
        return jnp.pad(m, ((0, 0), (0, Hp - H)))

    wx_blocks = [w_ih[k * H:(k + 1) * H, :].T for k in range(4)] + [w_xg.T]
    wh_blocks = [w_hh[k * H:(k + 1) * H, :].T for k in range(4)] + [w_hg.T]
    b_blocks = [(b_ih + b_hh)[k * H:(k + 1) * H] for k in range(4)] + [b_xg + b_hg]

    # Single K = I + H contraction: w_all = [Wx_all ; Wh_all], xh = [x | h].
    w_all = jnp.concatenate(
        [pad_cols(jnp.concatenate([wx, wh], axis=0))
         for wx, wh in zip(wx_blocks, wh_blocks)],
        axis=1).astype(matmul_dtype)                                    # (K, 5*Hp)
    b_all = jnp.concatenate(
        [jnp.pad(b, (0, Hp - H)) for b in b_blocks])[None].astype(jnp.float32)

    xh = jnp.concatenate([x, h2], axis=1).astype(matmul_dtype)          # (B, K)
    c_in = jnp.pad(c2, ((0, 0), (0, Hp - H))).astype(jnp.float32)       # (B, Hp)

    # ---- batch tile choice ----
    if B <= 16:
        tb = B                                    # tiny batch: one step
    elif B <= block_b:
        # aim for >= 2 grid steps so the "parallel" axis can shard across the
        # two TensorCores of a v7x chip
        tb = max(8, _round_up(-(-B // 2), 8))
    else:
        tb = block_b
    grid = (pl.cdiv(B, tb),)

    in_itemsize = jnp.dtype(matmul_dtype).itemsize
    cost = pl.CostEstimate(
        flops=2 * B * K * 5 * Hp,
        transcendentals=6 * B * Hp,
        bytes_accessed=(in_itemsize * (B * K + K * 5 * Hp)
                        + 4 * (5 * Hp + B * Hp + 3 * B * Hp)),
    )

    out = pl.pallas_call(
        sentinel_lstm_kernel,
        out_shape=jax.ShapeDtypeStruct((B, 3 * Hp), jnp.float32),
        grid=grid,
        in_specs=[
            pl.BlockSpec((tb, K), lambda i: (i, 0)),        # [x | h]  (batch-tiled)
            pl.BlockSpec((tb, Hp), lambda i: (i, 0)),       # c_tm1    (batch-tiled)
            pl.BlockSpec((K, 5 * Hp), lambda i: (0, 0),     # fused weights
                         pipeline_mode=pl.Buffered(1)),     #   VMEM-resident, 1 buf
            pl.BlockSpec((1, 5 * Hp), lambda i: (0, 0),     # fused bias
                         pipeline_mode=pl.Buffered(1)),
        ],
        out_specs=pl.BlockSpec((tb, 3 * Hp), lambda i: (i, 0)),
        compiler_params=pltpu.CompilerParams(
            dimension_semantics=("parallel",),
        ),
        cost_estimate=cost,
    )(xh, c_in, w_all, b_all)

    # Split the lane-dense slab into the 4 module outputs (cheap wrapper slices).
    h_t = out[:, 0 * Hp:0 * Hp + H].astype(x.dtype)
    c_t = out[:, 1 * Hp:1 * Hp + H]            # keep f32 (cell-state precision)
    s_t = out[:, 2 * Hp:2 * Hp + H].astype(x.dtype)
    return h_t[:, None, :], c_t[:, None, :], h_t, s_t


if __name__ == "__main__":
    # Small shapes consistent with the module: batch=2, input_size=64, hidden=32.
    B, I, H = 2, 64, 32

    key = jax.random.PRNGKey(0)
    ks = jax.random.split(key, 11)

    x = jax.random.normal(ks[0], (B, I), dtype=jnp.float32)
    h0 = jax.random.normal(ks[1], (B, 1, H), dtype=jnp.float32)
    c0 = jax.random.normal(ks[2], (B, 1, H), dtype=jnp.float32)

    def uni(k, shape, fan_in):
        bound = 1.0 / jnp.sqrt(jnp.float32(fan_in))
        return jax.random.uniform(k, shape, minval=-bound, maxval=bound,
                                  dtype=jnp.float32)

    # PyTorch-style deterministic parameters.
    w_ih = uni(ks[3], (4 * H, I), H)   # LSTMCell init bound = 1/sqrt(hidden)
    w_hh = uni(ks[4], (4 * H, H), H)
    b_ih = uni(ks[5], (4 * H,), H)
    b_hh = uni(ks[6], (4 * H,), H)
    w_xg = uni(ks[7], (H, I), I)       # Linear init bound = 1/sqrt(fan_in)
    b_xg = uni(ks[8], (H,), I)
    w_hg = uni(ks[9], (H, H), H)
    b_hg = uni(ks[10], (H,), H)

    outs = sentinel_lstm(x, (h0, c0),
                         w_ih, w_hh, b_ih, b_hh,
                         w_xg, b_xg, w_hg, b_hg)
    outs = jax.block_until_ready(outs)
    h_seq, c_seq, h_t, s_t = outs

    # Pure-JAX reference (PyTorch LSTMCell semantics, gate order i, f, g, o),
    # with the same bf16 rounding of matmul operands the kernel applies
    # (accumulation in f32), so tolerances stay tight.
    def bf(a):
        return a.astype(jnp.bfloat16).astype(jnp.float32)

    h2 = h0.reshape(B, H)
    c2 = c0.reshape(B, H)
    gates = (jnp.dot(bf(x), bf(w_ih).T, preferred_element_type=jnp.float32)
             + jnp.dot(bf(h2), bf(w_hh).T, preferred_element_type=jnp.float32)
             + b_ih + b_hh)
    ig = jax.nn.sigmoid(gates[:, :H])
    fg = jax.nn.sigmoid(gates[:, H:2 * H])
    gg = jnp.tanh(gates[:, 2 * H:3 * H])
    og = jax.nn.sigmoid(gates[:, 3 * H:4 * H])
    c_ref = fg * c2 + ig * gg
    h_ref = og * jnp.tanh(c_ref)
    sv_ref = jax.nn.sigmoid(
        jnp.dot(bf(h2), bf(w_hg).T, preferred_element_type=jnp.float32) + b_hg
        + jnp.dot(bf(x), bf(w_xg).T, preferred_element_type=jnp.float32) + b_xg)
    s_ref = sv_ref * jnp.tanh(c_ref)

    assert h_seq.shape == (B, 1, H) and c_seq.shape == (B, 1, H)
    assert h_t.shape == (B, H) and s_t.shape == (B, H)
    assert jnp.allclose(h_seq[:, 0], h_ref, atol=1e-4, rtol=1e-4)
    assert jnp.allclose(c_seq[:, 0], c_ref, atol=1e-4, rtol=1e-4)
    assert jnp.allclose(h_t, h_ref, atol=1e-4, rtol=1e-4)
    assert jnp.allclose(s_t, s_ref, atol=1e-4, rtol=1e-4)

    print("KERNEL_OK")
</pallas_src>

<mosaic_0001>
module attributes {stable_mosaic.version = 11 : i64} {
  func.func @sentinel_lstm_kernel(%arg0: i32, %arg1: memref<2x96xbf16, #tpu.memory_space<vmem>>, %arg2: memref<2x128xf32, #tpu.memory_space<vmem>>, %arg3: memref<96x640xbf16, #tpu.memory_space<vmem>>, %arg4: memref<1x640xf32, #tpu.memory_space<vmem>>, %arg5: memref<2x384xf32, #tpu.memory_space<vmem>>) attributes {dimension_semantics = [#tpu.dimension_semantics<parallel>], iteration_bounds = array<i64: 1>, scalar_prefetch = 0 : i64, scratch_operands = 0 : i64, tpu.core_type = #tpu.core_type<tc>, window_params = [{transform_indices = @transform_0, window_bounds = array<i64: 2, 96>}, {transform_indices = @transform_1, window_bounds = array<i64: 2, 128>}, {pipeline_mode = #tpu.pipeline_mode<synchronous>, transform_indices = @transform_2, window_bounds = array<i64: 96, 640>}, {pipeline_mode = #tpu.pipeline_mode<synchronous>, transform_indices = @transform_3, window_bounds = array<i64: 1, 640>}, {transform_indices = @transform_4, window_bounds = array<i64: 2, 384>}]} {
    %c0 = arith.constant 0 : index
    %c0_0 = arith.constant 0 : index
    %0 = vector.load %arg1[%c0, %c0_0] : memref<2x96xbf16, #tpu.memory_space<vmem>>, vector<2x96xbf16>
    %c0_1 = arith.constant 0 : index
    %c0_2 = arith.constant 0 : index
    %1 = vector.load %arg3[%c0_1, %c0_2] : memref<96x640xbf16, #tpu.memory_space<vmem>>, vector<96x640xbf16>
    %cst = arith.constant dense<0.000000e+00> : vector<2x640xf32>
    %2 = tpu.matmul %0, %1, %cst {dimension_numbers = #tpu.dot_dimension_numbers<[1], [0], [0], [1], [0, 0, 1, 1], [], []>} : vector<2x96xbf16>, vector<96x640xbf16>, vector<2x640xf32> -> vector<2x640xf32>
    %c0_3 = arith.constant 0 : index
    %c0_4 = arith.constant 0 : index
    %3 = vector.load %arg4[%c0_3, %c0_4] : memref<1x640xf32, #tpu.memory_space<vmem>>, vector<1x640xf32>
    %4 = vector.broadcast %3 : vector<1x640xf32> to vector<2x640xf32>
    %5 = arith.addf %2, %4 : vector<2x640xf32>
    %6 = vector.extract_strided_slice %5 {offsets = [0, 0], sizes = [2, 128], strides = [1, 1]} : vector<2x640xf32> to vector<2x128xf32>
    %cst_5 = arith.constant 5.000000e-01 : f32
    %7 = vector.broadcast %cst_5 : f32 to vector<2x128xf32>
    %8 = arith.mulf %7, %6 : vector<2x128xf32>
    %9 = math.tanh %8 : vector<2x128xf32>
    %cst_6 = arith.constant 5.000000e-01 : f32
    %10 = vector.broadcast %cst_6 : f32 to vector<2x128xf32>
    %11 = arith.mulf %10, %9 : vector<2x128xf32>
    %cst_7 = arith.constant 5.000000e-01 : f32
    %12 = vector.broadcast %cst_7 : f32 to vector<2x128xf32>
    %13 = arith.addf %11, %12 : vector<2x128xf32>
    %14 = vector.extract_strided_slice %5 {offsets = [0, 128], sizes = [2, 128], strides = [1, 1]} : vector<2x640xf32> to vector<2x128xf32>
    %cst_8 = arith.constant 5.000000e-01 : f32
    %15 = vector.broadcast %cst_8 : f32 to vector<2x128xf32>
    %16 = arith.mulf %15, %14 : vector<2x128xf32>
    %17 = math.tanh %16 : vector<2x128xf32>
    %cst_9 = arith.constant 5.000000e-01 : f32
    %18 = vector.broadcast %cst_9 : f32 to vector<2x128xf32>
    %19 = arith.mulf %18, %17 : vector<2x128xf32>
    %cst_10 = arith.constant 5.000000e-01 : f32
    %20 = vector.broadcast %cst_10 : f32 to vector<2x128xf32>
    %21 = arith.addf %19, %20 : vector<2x128xf32>
    %22 = vector.extract_strided_slice %5 {offsets = [0, 256], sizes = [2, 128], strides = [1, 1]} : vector<2x640xf32> to vector<2x128xf32>
    %23 = math.tanh %22 : vector<2x128xf32>
    %24 = vector.extract_strided_slice %5 {offsets = [0, 384], sizes = [2, 128], strides = [1, 1]} : vector<2x640xf32> to vector<2x128xf32>
    %cst_11 = arith.constant 5.000000e-01 : f32
    %25 = vector.broadcast %cst_11 : f32 to vector<2x128xf32>
    %26 = arith.mulf %25, %24 : vector<2x128xf32>
    %27 = math.tanh %26 : vector<2x128xf32>
    %cst_12 = arith.constant 5.000000e-01 : f32
    %28 = vector.broadcast %cst_12 : f32 to vector<2x128xf32>
    %29 = arith.mulf %28, %27 : vector<2x128xf32>
    %cst_13 = arith.constant 5.000000e-01 : f32
    %30 = vector.broadcast %cst_13 : f32 to vector<2x128xf32>
    %31 = arith.addf %29, %30 : vector<2x128xf32>
    %32 = vector.extract_strided_slice %5 {offsets = [0, 512], sizes = [2, 128], strides = [1, 1]} : vector<2x640xf32> to vector<2x128xf32>
    %cst_14 = arith.constant 5.000000e-01 : f32
    %33 = vector.broadcast %cst_14 : f32 to vector<2x128xf32>
    %34 = arith.mulf %33, %32 : vector<2x128xf32>
    %35 = math.tanh %34 : vector<2x128xf32>
    %cst_15 = arith.constant 5.000000e-01 : f32
    %36 = vector.broadcast %cst_15 : f32 to vector<2x128xf32>
    %37 = arith.mulf %36, %35 : vector<2x128xf32>
    %cst_16 = arith.constant 5.000000e-01 : f32
    %38 = vector.broadcast %cst_16 : f32 to vector<2x128xf32>
    %39 = arith.addf %37, %38 : vector<2x128xf32>
    %c0_17 = arith.constant 0 : index
    %c0_18 = arith.constant 0 : index
    %40 = vector.load %arg2[%c0_17, %c0_18] : memref<2x128xf32, #tpu.memory_space<vmem>>, vector<2x128xf32>
    %41 = arith.mulf %21, %40 : vector<2x128xf32>
    %42 = arith.mulf %13, %23 : vector<2x128xf32>
    %43 = arith.addf %41, %42 : vector<2x128xf32>
    %44 = math.tanh %43 : vector<2x128xf32>
    %45 = arith.mulf %31, %44 : vector<2x128xf32>
    %c0_19 = arith.constant 0 : index
    %c0_20 = arith.constant 0 : index
    %46 = vector.load %arg5[%c0_19, %c0_20] : memref<2x384xf32, #tpu.memory_space<vmem>>, vector<2x128xf32>
    tpu.vector_store %arg5[%c0_19, %c0_20], %45 {strides = array<i32>} : memref<2x384xf32, #tpu.memory_space<vmem>>, vector<2x128xf32>,
    %c0_21 = arith.constant 0 : index
    %c128 = arith.constant 128 : index
    %47 = vector.load %arg5[%c0_21, %c128] : memref<2x384xf32, #tpu.memory_space<vmem>>, vector<2x128xf32>
    tpu.vector_store %arg5[%c0_21, %c128], %43 {strides = array<i32>} : memref<2x384xf32, #tpu.memory_space<vmem>>, vector<2x128xf32>,
    %48 = arith.mulf %39, %44 : vector<2x128xf32>
    %c0_22 = arith.constant 0 : index
    %c256 = arith.constant 256 : index
    %49 = vector.load %arg5[%c0_22, %c256] : memref<2x384xf32, #tpu.memory_space<vmem>>, vector<2x128xf32>
    tpu.vector_store %arg5[%c0_22, %c256], %48 {strides = array<i32>} : memref<2x384xf32, #tpu.memory_space<vmem>>, vector<2x128xf32>,
    return
  }
  func.func @transform_0(%arg0: i32) -> (i32, i32) {
    %c0_i32 = arith.constant 0 : i32
    %c0_i32_0 = arith.constant 0 : i32
    return %arg0, %c0_i32 : i32, i32
  }
  func.func @transform_1(%arg0: i32) -> (i32, i32) {
    %c0_i32 = arith.constant 0 : i32
    %c0_i32_0 = arith.constant 0 : i32
    return %arg0, %c0_i32 : i32, i32
  }
  func.func @transform_2(%arg0: i32) -> (i32, i32) {
    %c0_i32 = arith.constant 0 : i32
    %c0_i32_0 = arith.constant 0 : i32
    %c0_i32_1 = arith.constant 0 : i32
    return %c0_i32, %c0_i32_0 : i32, i32
  }
  func.func @transform_3(%arg0: i32) -> (i32, i32) {
    %c0_i32 = arith.constant 0 : i32
    %c0_i32_0 = arith.constant 0 : i32
    %c0_i32_1 = arith.constant 0 : i32
    return %c0_i32, %c0_i32_0 : i32, i32
  }
  func.func @transform_4(%arg0: i32) -> (i32, i32) {
    %c0_i32 = arith.constant 0 : i32
    %c0_i32_0 = arith.constant 0 : i32
    return %arg0, %c0_i32 : i32, i32
  }
}

</mosaic_0001>

<bundles_post_ra>
// kernel: tpu_custom_call.1
= control target key start
LH: loop header
LB: loop body
LE: loop exit
PB: predicated region body
PF: predicated region fallthrough
CT: control target
= control target key end

     0   :  { %9 = vsyncpa [#allocation3], 0  ;;  %s750_s0 = inlined_call_operand.hbm [shape: bf16[2,96], index: 0, kind: input, shape index: {}]   ;;  %s751_s1 = inlined_call_operand.hbm [shape: f32[2,128], index: 1, kind: input, shape index: {}]   ;;  %s752_s2 = inlined_call_operand.hbm [shape: bf16[96,640], index: 2, kind: input, shape index: {}]   ;;  %s753_s3 = inlined_call_operand.hbm [shape: f32[1,640], index: 3, kind: input, shape index: {}]   ;;  %s754_s4 = inlined_call_operand.hbm [shape: f32[2,384], index: 4, kind: output, shape index: {}]  }
   0x1   :  { %10 = vsyncpa [#allocation6], 0 }
   0x2   :  { %11 = vsyncpa [#allocation9], 0  ;;  %s29_s17 = sshll.u32 %s751_s1, 4  ;;  %s30_s17 = int_to_ptr.hbm [resolvable:$true] %s29_s17 }
   0x3   :  { %12 = vsyncpa [#allocation4], 0  ;;  %s698_s18 = smov [#allocation5]   ;;  %s18_s22 = sshll.u32 %s750_s0, 4  ;;  %s19_s22 = int_to_ptr.hbm [resolvable:$true] %s18_s22 }
   0x4   :  { %s31_s19 = sshll.u32 %s698_s18, 4  ;;  %s699_s23 = smov [#allocation2]   ;;  %s32_s19 = int_to_ptr.vmem [resolvable:$true] %s31_s19 }
   0x5   :  { %34 = dma.hbm_to_vmem [thread:$0]  %s30_s17, 32, %s32_s19, [#allocation6]  }
   0x6   :  { %s20_s24 = sshll.u32 %s699_s23, 4  ;;  %s39_s27 = sshll.u32 %s752_s2, 4  ;;  %s21_s24 = int_to_ptr.vmem [resolvable:$true] %s20_s24  ;;  %s40_s27 = int_to_ptr.hbm [resolvable:$true] %s39_s27 }
   0x7   :  { %23 = dma.hbm_to_vmem [thread:$0]  %s19_s22, 16, %s21_s24, [#allocation3]  }
   0x8   :  { %s700_s1 = smov [#allocation7]   ;;  %s53_s5 = sshll.u32 %s753_s3, 4  ;;  %s54_s5 = int_to_ptr.hbm [resolvable:$true] %s53_s5 }
   0x9   :  { %s41_s28 = sshll.u32 %s700_s1, 4  ;;  %s701_s6 = smov 320   ;;  %s42_s28 = int_to_ptr.vmem [resolvable:$true] %s41_s28 }
   0xa   :  { %s702_s0 = smov 20   ;;  %s703_s7 = smov [#allocation8]  }
   0xb   :  { %47 = dma.hbm_to_vmem [thread:$0]  %s40_s27, 3840, %s42_s28, [#allocation6], %s701_s6, %s701_s6, %s702_s0  }
   0xc   :  { %s55_s8 = sshll.u32 %s703_s7, 4  ;;  %s56_s8 = int_to_ptr.vmem [resolvable:$true] %s55_s8 }
   0xd   :  { %58 = dma.hbm_to_vmem [thread:$0]  %s54_s5, 80, %s56_s8, [#allocation9]  }
   0xe   :  { %690 = dma.done.wait [#allocation3], 16  }
   0xf   :  { %691 = vsyncadd [#allocation3], 4294967280 }
  0x10   :  { %692 = dma.done.wait [#allocation6], 3872  }
  0x11   :  { %693 = vsyncadd [#allocation6], 4294963424 }
  0x12   :  { %694 = dma.done.wait [#allocation9], 80  }
  0x13   :  { %695 = vsyncadd [#allocation9], 4294967216  ;;  %v498_v0 = vld [vmem:[#allocation7 + $0xc8] sm:$0xf]  ;;  %v548_v1 = vld [vmem:[#allocation7 + $0xd8] sm:$0xf0] }
  0x14   :  { %v546_v2 = vld [vmem:[#allocation7 + $0xcc] sm:$0xf]  ;;  %v499_v3 = vor.u32 %v548_v1, %v498_v0  ;;  %v500_v4 = vld [vmem:[#allocation7 + $0xdc] sm:$0xf0]  ;;  %v506_v5 = vld [vmem:[#allocation7 + $0xd0] sm:$0xf] }
  0x15   :  { %v549_v6 = vld [vmem:[#allocation7 + $0xe0] sm:$0xf0]  ;;  %v503_v7 = vor.u32 %v546_v2, %v500_v4  ;;  %v478_v9 = vld [vmem:[#allocation7 + $0xa0] sm:$0xf]  ;;  %v543_v10 = vld [vmem:[#allocation7 + $0xb0] sm:$0xf0] }
  0x16   :  { %v507_v8 = vor.u32 %v549_v6, %v506_v5  ;;  %v541_v11 = vld [vmem:[#allocation7 + $0xa4] sm:$0xf]  ;;  %287 = vmatpush.bf16.msra.mxu0 %v499_v3  ;;  %v479_v12 = vor.u32 %v543_v10, %v478_v9  ;;  %v480_v13 = vld [vmem:[#allocation7 + $0xb4] sm:$0xf0]  ;;  %v486_v14 = vld [vmem:[#allocation7 + $0xa8] sm:$0xf] }
  0x17   :  { %v544_v15 = vld [vmem:[#allocation7 + $0xb8] sm:$0xf0]  ;;  %300 = vmatpush.bf16.msra.mxu1 %v503_v7  ;;  %v483_v16 = vor.u32 %v541_v11, %v480_v13  ;;  %v547_v18 = vld [vmem:[#allocation7 + $0xd4] sm:$0xf]  ;;  %v508_v19 = vld [vmem:[#allocation7 + $0xe4] sm:$0xf0] }
  0x18   :  { %313 = vmatpush.bf16.msra.mxu2 %v507_v8  ;;  %v487_v17 = vor.u32 %v544_v15, %v486_v14  ;;  %v458_v20 = vld [vmem:[#allocation7 + $0x78] sm:$0xf]  ;;  %v511_v21 = vor.u32 %v547_v18, %v508_v19  ;;  %v538_v22 = vld [vmem:[#allocation7 + $0x88] sm:$0xf0]  ;;  %v536_v23 = vld [vmem:[#allocation7 + $0x7c] sm:$0xf] }
  0x19   :  { %v460_v24 = vld [vmem:[#allocation7 + $0x8c] sm:$0xf0]  ;;  %v466_v25 = vld [vmem:[#allocation7 + $0x80] sm:$0xf]  ;;  %v539_v26 = vld [vmem:[#allocation7 + $0x90] sm:$0xf0]  ;;  %v459_v28 = vor.u32 %v538_v22, %v458_v20 }
  0x1a   :  { %v542_v27 = vld [vmem:[#allocation7 + $0xac] sm:$0xf]  ;;  %288 = vmatpush.bf16.msra.mxu0 %v479_v12  ;;  %326 = vmatpush.bf16.msra.mxu3 %v511_v21  ;;  %v488_v29 = vld [vmem:[#allocation7 + $0xbc] sm:$0xf0]  ;;  %v438_v30 = vld [vmem:[#allocation7 + $0x50] sm:$0xf]  ;;  %v463_v32 = vor.u32 %v536_v23, %v460_v24  ;;  %v467_v33 = vor.u32 %v539_v26, %v466_v25 }
  0x1b   :  { %v533_v31 = vld [vmem:[#allocation7 + $0x60] sm:$0xf0]  ;;  %301 = vmatpush.bf16.msra.mxu1 %v483_v16  ;;  %v491_v34 = vor.u32 %v542_v27, %v488_v29  ;;  %v531_v35 = vld [vmem:[#allocation7 + $0x54] sm:$0xf]  ;;  %v440_v36 = vld [vmem:[#allocation7 + $0x64] sm:$0xf0] }
  0x1c   :  { %314 = vmatpush.bf16.msra.mxu2 %v487_v17  ;;  %v446_v37 = vld [vmem:[#allocation7 + $0x58] sm:$0xf]  ;;  %v534_v38 = vld [vmem:[#allocation7 + $0x68] sm:$0xf0]  ;;  %v537_v39 = vld [vmem:[#allocation7 + $0x84] sm:$0xf]  ;;  %v439_v41 = vor.u32 %v533_v31, %v438_v30  ;;  %v443_v45 = vor.u32 %v531_v35, %v440_v36 }
  0x1d   :  { %v468_v40 = vld [vmem:[#allocation7 + $0x94] sm:$0xf0]  ;;  %v418_v43 = vld [vmem:[#allocation7 + $0x28] sm:$0xf]  ;;  %v528_v44 = vld [vmem:[#allocation7 + $0x38] sm:$0xf0]  ;;  %v447_v46 = vor.u32 %v534_v38, %v446_v37 }
  0x1e   :  { %289 = vmatpush.bf16.msra.mxu0 %v459_v28  ;;  %327 = vmatpush.bf16.msra.mxu3 %v491_v34  ;;  %v471_v42 = vor.u32 %v537_v39, %v468_v40  ;;  %v526_v47 = vld [vmem:[#allocation7 + $0x2c] sm:$0xf]  ;;  %v532_v48 = vld [vmem:[#allocation7 + $0x5c] sm:$0xf]  ;;  %v448_v49 = vld [vmem:[#allocation7 + $0x6c] sm:$0xf0]  ;;  %v419_v53 = vor.u32 %v528_v44, %v418_v43 }
  0x1f   :  { %302 = vmatpush.bf16.msra.mxu1 %v463_v32  ;;  %v420_v50 = vld [vmem:[#allocation7 + $0x3c] sm:$0xf0]  ;;  %v426_v51 = vld [vmem:[#allocation7 + $0x30] sm:$0xf]  ;;  %v529_v52 = vld [vmem:[#allocation7 + $0x40] sm:$0xf0]  ;;  %v451_v54 = vor.u32 %v532_v48, %v448_v49 }
  0x20   :  { %315 = vmatpush.bf16.msra.mxu2 %v467_v33  ;;  %v398_v55 = vld [vmem:[#allocation7] sm:$0xf]  ;;  %v523_v56 = vld [vmem:[#allocation7 + $0x10] sm:$0xf0]  ;;  %v423_v57 = vor.u32 %v526_v47, %v420_v50  ;;  %v427_v58 = vor.u32 %v529_v52, %v426_v51  ;;  %v514_v59 = vld [vmem:[#allocation7 + $0xd8] sm:$0xf] }
  0x21   :  { %v527_v60 = vld [vmem:[#allocation7 + $0x34] sm:$0xf]  ;;  %v428_v61 = vld [vmem:[#allocation7 + $0x44] sm:$0xf0]  ;;  %v550_v62 = vld [vmem:[#allocation7 + $0xe8] sm:$0xf0]  ;;  %v399_v3 = vor.u32 %v523_v56, %v398_v55 }
  0x22   :  { %290 = vmatpush.bf16.msra.mxu0 %v439_v41  ;;  %328 = vmatpush.bf16.msra.mxu3 %v471_v42  ;;  %v521_v63 = vld [vmem:[#allocation7 + $0x4] sm:$0xf]  ;;  %v400_v0 = vld [vmem:[#allocation7 + $0x14] sm:$0xf0]  ;;  %v406_v1 = vld [vmem:[#allocation7 + $0x8] sm:$0xf]  ;;  %v431_v4 = vor.u32 %v527_v60, %v428_v61  ;;  %v515_v5 = vor.u32 %v550_v62, %v514_v59 }
  0x23   :  { %303 = vmatpush.bf16.msra.mxu1 %v443_v45  ;;  %v524_v2 = vld [vmem:[#allocation7 + $0x18] sm:$0xf0]  ;;  %v403_v6 = vor.u32 %v521_v63, %v400_v0  ;;  %v522_v7 = vld [vmem:[#allocation7 + $0xc] sm:$0xf]  ;;  %v408_v8 = vld [vmem:[#allocation7 + $0x1c] sm:$0xf0] }
  0x24   :  { %316 = vmatpush.bf16.msra.mxu2 %v447_v46  ;;  %v407_v9 = vor.u32 %v524_v2, %v406_v1  ;;  %v494_v10 = vld [vmem:[#allocation7 + $0xb0] sm:$0xf]  ;;  %v545_v11 = vld [vmem:[#allocation7 + $0xc0] sm:$0xf0]  ;;  %v76_v12 = vld [vmem:[#allocation2] sm:$0x1]  ;;  %v411_v13 = vor.u32 %v522_v7, %v408_v8 }
  0x25   :  { %vm281_vm0 = vcmask 785408   ;;  %v495_v14 = vor.u32 %v545_v11, %v494_v10  ;;  %v474_v15 = vld [vmem:[#allocation7 + $0x88] sm:$0xf]  ;;  %v540_v16 = vld [vmem:[#allocation7 + $0x98] sm:$0xf0]  ;;  %s704_s2 = smov [#allocation10]  }
  0x26   :  { %291 = vmatpush.bf16.msra.mxu0 %v419_v53  ;;  %329 = vmatpush.bf16.msra.mxu3 %v451_v54  ;;  %v475_v17 = vor.u32 %v540_v16, %v474_v15  ;;  %v454_v18 = vld [vmem:[#allocation7 + $0x60] sm:$0xf]  ;;  %v535_v19 = vld [vmem:[#allocation7 + $0x70] sm:$0xf0]  ;;  %v434_v21 = vld [vmem:[#allocation7 + $0x38] sm:$0xf] }
  0x27   :  { %304 = vmatpush.bf16.msra.mxu1 %v423_v57  ;;  %v455_v20 = vor.u32 %v535_v19, %v454_v18  ;;  %v530_v22 = vld [vmem:[#allocation7 + $0x48] sm:$0xf0]  ;;  %v414_v24 = vld [vmem:[#allocation7 + $0x10] sm:$0xf]  ;;  %v525_v25 = vld [vmem:[#allocation7 + $0x20] sm:$0xf0] }
  0x28   :  { %317 = vmatpush.bf16.msra.mxu2 %v427_v58  ;;  %v435_v23 = vor.u32 %v530_v22, %v434_v21  ;;  %v415_v26 = vor.u32 %v525_v25, %v414_v24  ;;  %v113_v27 = vld [vmem:[#allocation8] sm:$0x1f]  ;;  %v367_v50 = vld [vmem:[#allocation5] sm:$0x3]  ;;  %s382_s3 = sshll.u32 %s704_s2, 4  ;;  %s384_s11 = sshll.u32 %s754_s4, 4  ;;  %s383_s3 = int_to_ptr.vmem [resolvable:$true] %s382_s3  ;;  %s385_s11 = int_to_ptr.hbm [resolvable:$true] %s384_s11 }
  0x29   :  { %v115_v28 = vperm.slane %v113_v27, 0  ;;  %v116_v29 = vperm.slane %v113_v27, 1  ;;  %v117_v36 = vperm.slane %v113_v27, 2  ;;  %v118_v37 = vperm.slane %v113_v27, 3 }
  0x2a   :  { %292 = vmatpush.bf16.msra.mxu0 %v399_v3  ;;  %330 = vmatpush.bf16.msra.mxu3 %v431_v4  ;;  %v119_v57 = vperm.slane %v113_v27, 4 }
  0x2b   :  { %305 = vmatpush.bf16.msra.mxu1 %v403_v6 }
  0x2c   :  { %318 = vmatpush.bf16.msra.mxu2 %v407_v9 }
  0x2d   :  { %516 = vmatmul.msk.bf16.vlgmr.msra.gmra.mxu0 %vm281_vm0, %v76_v12 }
  0x2e   :  { %339 = vmatpush.bf16.msrb.mxu0 %v515_v5  ;;  %517 = vmatmul.msk.bf16.vlgmr.msra.gmra.mxu1 %vm281_vm0, %v76_v12 }
  0x2f   :  { %331 = vmatpush.bf16.msra.mxu3 %v411_v13  ;;  %518 = vmatmul.msk.bf16.vlgmr.msra.gmra.mxu2 %vm281_vm0, %v76_v12 }
  0x32   :  { %340 = vmatpush.bf16.msrb.mxu0 %v495_v14  ;;  %519 = vmatmul.msk.bf16.vlgmr.msra.gmra.mxu3 %vm281_vm0, %v76_v12 }
  0x36   :  { %341 = vmatpush.bf16.msrb.mxu0 %v475_v17 }
  0x3a   :  { %342 = vmatpush.bf16.msrb.mxu0 %v455_v20 }
  0x3e   :  { %343 = vmatpush.bf16.msrb.mxu0 %v435_v23 }
  0x42   :  { %344 = vmatpush.bf16.msrb.mxu0 %v415_v26 }
  0x45   :  { %520 = vmatmul.msk.bf16.vlgmr.msrb.gmra.mxu0 %vm281_vm0, %v76_v12 }
  0xaa   :  { %v294_v30 = vpop.f32.mrf.mxu0 }
  0xab   :  { %v295_v31 = vadd.f32 %v294_v30, %v115_v28  ;;  %v307_v32 = vpop.f32.mrf.mxu1 }
  0xac   :  { %v308_v33 = vadd.f32 %v307_v32, %v116_v29 }
  0xad   :  { %v350_v34 = vmul.f32 0.5, %v295_v31 }
  0xae   :  { %v354_v35 = vmul.f32 0.5, %v308_v33 }
  0xaf   :  { %558 = vtanh.f32 %v350_v34 }
  0xb0   :  { %560 = vtanh.f32 %v354_v35 }
  0xb2   :  { %v296_v38 = vpop.f32.mrf.mxu0  ;;  %v320_v39 = vpop.f32.mrf.mxu2 }
  0xb3   :  { %v321_v40 = vadd.f32 %v320_v39, %v117_v36  ;;  %v309_v41 = vpop.f32.mrf.mxu1 }
  0xb5   :  { %v333_v42 = vpop.f32.mrf.mxu3  ;;  %v559_v43 = vpop.eup %558  ;;  %562 = vtanh.f32 %v321_v40 }
  0xb6   :  { %v334_v44 = vadd.f32 %v333_v42, %v118_v37  ;;  %v561_v45 = vpop.eup %560  ;;  %v352_v46 = vmul.f32 0.5, %v559_v43 }
  0xb7   :  { %v356_v47 = vmul.f32 0.5, %v561_v45 }
  0xb8   :  { %v359_v48 = vmul.f32 0.5, %v334_v44  ;;  %v353_v49 = vadd.f32 0.5, %v352_v46 }
  0xb9   :  { %v357_v51 = vadd.f32 0.5, %v356_v47 }
  0xba   :  { %564 = vtanh.f32 %v359_v48  ;;  %v322_v52 = vpop.f32.mrf.mxu2 }
  0xbb   :  { %v563_v53 = vpop.eup %562  ;;  %v368_v54 = vmul.f32 %v367_v50, %v357_v51 }
  0xbc   :  { %v369_v55 = vmul.f32 %v563_v53, %v353_v49 }
  0xbd   :  { %v335_v56 = vpop.f32.mrf.mxu3 }
  0xbe   :  { %v370_v58 = vadd.f32 %v369_v55, %v368_v54 }
  0xc0   :  { %v565_v59 = vpop.eup %564  ;;  %566 = vtanh.f32 %v370_v58  ;;  %374 = vst [vmem:[#allocation10 + $0x2] sm:$0x3] %v370_v58 }
  0xc1   :  { %v361_v61 = vmul.f32 0.5, %v565_v59 }
  0xc2   :  { %v346_v60 = vpop.f32.mrf.mxu0 }
  0xc3   :  { %v347_v62 = vadd.f32 %v346_v60, %v119_v57  ;;  %v362_v0 = vadd.f32 0.5, %v361_v61 }
  0xc5   :  { %v363_v63 = vmul.f32 0.5, %v347_v62 }
  0xc6   :  { %v567_v1 = vpop.eup %566 }
  0xc7   :  { %568 = vtanh.f32 %v363_v63  ;;  %v372_v2 = vmul.f32 %v567_v1, %v362_v0 }
  0xc9   :  { %373 = vst [vmem:[#allocation10] sm:$0x3] %v372_v2 }
  0xca   :  { %v348_v3 = vpop.f32.mrf.mxu0 }
  0xcd   :  { %v569_v4 = vpop.eup %568 }
  0xce   :  { %v365_v5 = vmul.f32 0.5, %v569_v4 }
  0xd0   :  { %v366_v6 = vadd.f32 0.5, %v365_v5 }
  0xd2   :  { %v375_v7 = vmul.f32 %v567_v1, %v366_v6 }
  0xd4   :  { %376 = vst [vmem:[#allocation10 + $0x4] sm:$0x3] %v375_v7 }
  0xd5   :  { %387 = dma.vmem_to_hbm [thread:$0]  %s383_s3, 96, %s385_s11, [#allocation4]  }
  0xd6   :  { %696 = dma.done.wait [#allocation4], 96  }
  0xd7   :  { %697 = vsyncadd [#allocation4], 4294967200 }
  0xd8   :  { %392 = vsyncpa [#allocation3], 1 }
  0xd9   :  { %393 = vsyncpa [#allocation6], 1 }
  0xda   :  { %394 = vsyncpa [#allocation9], 1 }
  0xdb   :  { %395 = vsyncpa [#allocation4], 1 }

</bundles_post_ra>
